<compile_context>
chip_gen: v5e
topology: v5e:2x2
jax: 0.10.0
libtpu: 0.0.40
codegen_flags: <defaults>
</compile_context>

<pallas_src>
import functools

import jax
import jax.numpy as jnp
from jax import lax
from jax.experimental import pallas as pl
from jax.experimental.pallas import tpu as pltpu

_LANE = 128


@functools.lru_cache(maxsize=None)
def _budgets():
    """(vmem_limit_bytes, tile_budget_bytes) chosen per TPU generation."""
    try:
        cap = pltpu.get_tpu_info().vmem_capacity_bytes
    except Exception:  # unknown part / no query available -> conservative
        cap = 64 * 1024 * 1024
    if cap >= 96 * 1024 * 1024:                   # v5e / v6e: 128 MiB VMEM
        return 64 * 1024 * 1024, 20 * 1024 * 1024
    return 32 * 1024 * 1024, 8 * 1024 * 1024      # v7x: 64 MiB VMEM


def _choose_tk(c, hw, tile_budget):
    """K tile: multiple of 128 (or the full H*W extent) keeping two
    double-buffered (C, tk) f32 tiles within the tile budget."""
    tk = tile_budget // (2 * c * 4)
    tk = max(_LANE, (tk // _LANE) * _LANE)
    if tk >= hw:
        return hw          # single full-extent block: always a legal BlockSpec
    return tk              # multiple of 128; last tile may be ragged (masked)


def _gram_kernel(x_ref, out_ref, *, tk, hw, num_k, k_per_split, need_mask,
                 compute_dtype):
    # x_ref:   (C, tk) streamed feature tile (BlockSpec double-buffered DMA).
    # out_ref: (1, C, C) partial gram for this parallel split; VMEM-resident
    #          across the K axis (same output block for every j).
    s = pl.program_id(0)        # parallel split (v7x dual-TC)
    j = pl.program_id(1)        # K tile within the split (reduction axis)

    @pl.when(j == 0)
    def _():
        out_ref[...] = jnp.zeros_like(out_ref)

    x = x_ref[...]
    if need_mask:
        # Logical K-tile index.  Tiles past num_k (grid overhang from the
        # 2-way split) and lanes past hw (ragged last tile) must contribute
        # nothing: Pallas OOB block reads are unspecified, so zero them before
        # the dot (cheap VPU select on a slot with slack).
        t = s * k_per_split + j
        col = t * tk + lax.broadcasted_iota(jnp.int32, x.shape, 1)
        x = jnp.where(col < hw, x, jnp.zeros_like(x))
    if compute_dtype != jnp.float32:
        x = x.astype(compute_dtype)
    # Contract the last dim of BOTH operands => X @ X.T without a transposed copy.
    acc = lax.dot_general(
        x, x,
        dimension_numbers=(((1,), (1,)), ((), ())),
        preferred_element_type=jnp.float32)
    out_ref[...] = out_ref[...] + acc[None, :, :]


def _gram_partials(xm, tk, n_split, vmem_limit, compute_dtype):
    """Tiled partial grams of an unpadded (C, HW) matrix -> (n_split, C, C)."""
    c, hw = xm.shape
    num_k = pl.cdiv(hw, tk)
    k_per_split = pl.cdiv(num_k, n_split)
    need_mask = (hw % tk != 0) or (n_split * k_per_split != num_k)

    def x_index_map(s, j):
        # Clamp overhang tiles (s*kps + j >= num_k) to a valid block index;
        # their contribution is zeroed by the in-kernel mask.
        return 0, jnp.minimum(s * k_per_split + j, num_k - 1)

    kernel = functools.partial(
        _gram_kernel, tk=tk, hw=hw, num_k=num_k, k_per_split=k_per_split,
        need_mask=need_mask, compute_dtype=compute_dtype)

    return pl.pallas_call(
        kernel,
        out_shape=jax.ShapeDtypeStruct((n_split, c, c), jnp.float32),
        grid_spec=pltpu.PrefetchScalarGridSpec(
            num_scalar_prefetch=0,
            grid=(n_split, k_per_split),
            in_specs=[pl.BlockSpec((c, tk), x_index_map)],
            out_specs=pl.BlockSpec((1, c, c), lambda s, j: (s, 0, 0)),
        ),
        compiler_params=pltpu.CompilerParams(
            dimension_semantics=("parallel", "arbitrary"),
            vmem_limit_bytes=vmem_limit),
    )(xm)


def gram_matrix(x, *, compute_dtype=jnp.float32, _force_tk=None):
    """x: (1, C, H, W) -> (C, C) gram (X @ X.T, no normalization) via the
    K-streaming Pallas kernel.  `_force_tk` is test-only and must be a multiple
    of 128 (or >= H*W)."""
    n, c, h, w = x.shape
    assert n == 1, "gram_matrix (PyTorch .view(d, h*w)) requires batch == 1"
    hw = h * w
    xm = x.reshape(c, hw)
    if xm.dtype != jnp.float32:
        xm = xm.astype(jnp.float32)

    vmem_limit, tile_budget = _budgets()
    tk = _force_tk if _force_tk is not None else _choose_tk(c, hw, tile_budget)
    num_k = pl.cdiv(hw, tk)
    n_split = 2 if num_k >= 2 else 1          # engage both v7x TensorCores
    partials = _gram_partials(xm, tk, n_split, vmem_limit, compute_dtype)
    return jnp.sum(partials, axis=0) if n_split > 1 else partials[0]


@functools.partial(jax.jit, static_argnames=("compute_dtype",))
def _style_loss(x, target_gram, compute_dtype=jnp.float32):
    g = gram_matrix(x, compute_dtype=compute_dtype)
    # Tiny (C, C) combine + MSE epilogue in XLA, fused under jit.
    return jnp.mean(jnp.square(g - target_gram))


class StyleLoss:
    """JAX/Pallas mirror of the PyTorch StyleLoss module (forward pass)."""

    def __init__(self, target_feature, compute_dtype=jnp.float32):
        self._compute_dtype = compute_dtype
        # "Detached" by construction (no autodiff state carried).
        self.target = gram_matrix(target_feature, compute_dtype=compute_dtype)
        self.loss = None

    def __call__(self, x):
        self.loss = _style_loss(x, self.target,
                                compute_dtype=self._compute_dtype)
        return x   # forward returns the input unchanged


if __name__ == "__main__":
    key = jax.random.PRNGKey(0)
    k_tgt, k_x, k_r = jax.random.split(key, 3)

    # Batch must be 1 (PyTorch .view(d, h*w)); small C / spatial.
    N, C, H, W = 1, 8, 16, 16
    target_feature = jax.random.normal(k_tgt, (N, C, H, W), dtype=jnp.float32)
    x = jax.random.normal(k_x, (N, C, H, W), dtype=jnp.float32)

    module = StyleLoss(target_feature)
    out = jax.block_until_ready(module(x))
    loss = jax.block_until_ready(module.loss)

    # Pure-JAX reference (HIGHEST precision matmul matches the f32 MXU path).
    def ref_gram(t):
        _, d, h, w = t.shape
        m = t.reshape(d, h * w)
        return jnp.matmul(m, m.T, precision=lax.Precision.HIGHEST)

    loss_ref = jnp.mean((ref_gram(x) - ref_gram(target_feature)) ** 2)
    assert out.shape == x.shape and jnp.allclose(out, x)
    assert jnp.allclose(loss, loss_ref, rtol=1e-4, atol=1e-4), (loss, loss_ref)

    # Exercise the multi-tile path: parallel K split + ragged-last-tile mask +
    # grid-overhang clamp (hw = 320, tk = 128 -> 3 K tiles over 2 splits).
    xr = jax.random.normal(k_r, (1, 8, 16, 20), dtype=jnp.float32)
    g = jax.block_until_ready(gram_matrix(xr, _force_tk=128))
    assert jnp.allclose(g, ref_gram(xr), rtol=1e-5, atol=1e-4), "gram mismatch"

    print("KERNEL_OK")
</pallas_src>

<mosaic_0001>
module attributes {stable_mosaic.version = 11 : i64} {
  func.func @_gram_kernel(%arg0: i32, %arg1: i32, %arg2: memref<8x256xf32, #tpu.memory_space<vmem>>, %arg3: memref<1x8x8xf32, #tpu.memory_space<vmem>>) attributes {dimension_semantics = [#tpu.dimension_semantics<parallel>, #tpu.dimension_semantics<arbitrary>], iteration_bounds = array<i64: 1, 1>, scalar_prefetch = 0 : i64, scratch_operands = 0 : i64, tpu.core_type = #tpu.core_type<tc>, window_params = [{transform_indices = @transform_0, window_bounds = array<i64: 8, 256>}, {transform_indices = @transform_1, window_bounds = array<i64: 1, 8, 8>}]} {
    %c0_i32 = arith.constant 0 : i32
    %0 = arith.cmpi eq, %arg1, %c0_i32 : i32
    %1 = arith.extui %0 : i1 to i32
    %c0_i32_0 = arith.constant 0 : i32
    %2 = arith.cmpi ne, %1, %c0_i32_0 : i32
    scf.if %2 {
      %cst_8 = arith.constant 0.000000e+00 : f32
      %9 = vector.broadcast %cst_8 : f32 to vector<1x8x8xf32>
      %c0_9 = arith.constant 0 : index
      %c0_10 = arith.constant 0 : index
      %c0_11 = arith.constant 0 : index
      %10 = vector.load %arg3[%c0_9, %c0_10, %c0_11] : memref<1x8x8xf32, #tpu.memory_space<vmem>>, vector<1x8x8xf32>
      tpu.vector_store %arg3[%c0_9, %c0_10, %c0_11], %9 {strides = array<i32>} : memref<1x8x8xf32, #tpu.memory_space<vmem>>, vector<1x8x8xf32>,
    } else {
    }
    %c0 = arith.constant 0 : index
    %c0_1 = arith.constant 0 : index
    %3 = vector.load %arg2[%c0, %c0_1] : memref<8x256xf32, #tpu.memory_space<vmem>>, vector<8x256xf32>
    %cst = arith.constant dense<0.000000e+00> : vector<8x8xf32>
    %4 = tpu.matmul %3, %3, %cst {dimension_numbers = #tpu.dot_dimension_numbers<[1], [1], [0], [0], [0, 0, 1, 0], [], []>} : vector<8x256xf32>, vector<8x256xf32>, vector<8x8xf32> -> vector<8x8xf32>
    %c0_2 = arith.constant 0 : index
    %c0_3 = arith.constant 0 : index
    %c0_4 = arith.constant 0 : index
    %5 = vector.load %arg3[%c0_2, %c0_3, %c0_4] : memref<1x8x8xf32, #tpu.memory_space<vmem>>, vector<1x8x8xf32>
    %6 = vector.shape_cast %4 : vector<8x8xf32> to vector<1x8x8xf32>
    %7 = arith.addf %5, %6 : vector<1x8x8xf32>
    %c0_5 = arith.constant 0 : index
    %c0_6 = arith.constant 0 : index
    %c0_7 = arith.constant 0 : index
    %8 = vector.load %arg3[%c0_5, %c0_6, %c0_7] : memref<1x8x8xf32, #tpu.memory_space<vmem>>, vector<1x8x8xf32>
    tpu.vector_store %arg3[%c0_5, %c0_6, %c0_7], %7 {strides = array<i32>} : memref<1x8x8xf32, #tpu.memory_space<vmem>>, vector<1x8x8xf32>,
    return
  }
  func.func @transform_0(%arg0: i32, %arg1: i32) -> (i32, i32) {
    %c1_i32 = arith.constant 1 : i32
    %0 = arith.muli %arg0, %c1_i32 : i32
    %1 = arith.addi %0, %arg1 : i32
    %c0_i32 = arith.constant 0 : i32
    %2 = arith.minsi %1, %c0_i32 : i32
    %c0_i32_0 = arith.constant 0 : i32
    %c0_i32_1 = arith.constant 0 : i32
    return %c0_i32_0, %2 : i32, i32
  }
  func.func @transform_1(%arg0: i32, %arg1: i32) -> (i32, i32, i32) {
    %c0_i32 = arith.constant 0 : i32
    %c0_i32_0 = arith.constant 0 : i32
    %c0_i32_1 = arith.constant 0 : i32
    return %arg0, %c0_i32, %c0_i32_0 : i32, i32, i32
  }
}

</mosaic_0001>

<bundles_post_ra>
// kernel: tpu_custom_call.1
= control target key start
LH: loop header
LB: loop body
LE: loop exit
PB: predicated region body
PF: predicated region fallthrough
CT: control target
= control target key end

     0   :  { %6 = vsyncpa [#allocation3], 0  ;;  %s180_s0 = inlined_call_operand.hbm [shape: f32[8,256], index: 0, kind: input, shape index: {}]   ;;  %s181_s1 = inlined_call_operand.hbm [shape: f32[1,8,8], index: 1, kind: output, shape index: {}]  }
   0x1   :  { %7 = vsyncpa [#allocation4], 0  ;;  %s19_s8 = sshll.u32 %s180_s0, 4  ;;  %s159_s9 = smov [#allocation2]   ;;  %s20_s8 = int_to_ptr.hbm [resolvable:$true] %s19_s8 }
   0x2   :  { %s21_s10 = sshll.u32 %s159_s9, 4  ;;  %s22_s10 = int_to_ptr.vmem [resolvable:$true] %s21_s10 }
   0x3   :  { %24 = dma.hbm_to_vmem [thread:$0]  %s20_s8, 256, %s22_s10, [#allocation3]  }
   0x4   :  { %155 = dma.done.wait [#allocation3], 256  }
   0x5   :  { %156 = vsyncadd [#allocation3], 4294967040  ;;  %vm37_vm0 = vcmask 64512   ;;  %v160_v0 = vmov 0.0   ;;  %v39_v1 = vld [vmem:[#allocation2] sm:$0xff]  ;;  %v40_v2 = vld [vmem:[#allocation2 + $0x8] sm:$0xff] }
   0x6   :  { %38 = vst.msk [vmem:[#allocation5] sm:$0xff] %vm37_vm0, %v160_v0  ;;  %56 = vmatpush.xpose.msra.mxu0 %v39_v1  ;;  %76 = vmatpush.xpose.msra.mxu1 %v40_v2  ;;  %s161_s0 = smov [#allocation5]   ;;  %s92_s14 = sshll.u32 %s181_s1, 4  ;;  %s93_s14 = int_to_ptr.hbm [resolvable:$true] %s92_s14 }
   0x7   :  { %s90_s11 = sshll.u32 %s161_s0, 4  ;;  %s91_s11 = int_to_ptr.vmem [resolvable:$true] %s90_s11 }
   0x9   :  { %57 = vmatmul.f32.vlgmr.msra.gmra.mxu0 %v39_v1  ;;  %77 = vmatmul.f32.vlgmr.msra.gmra.mxu1 %v40_v2 }
   0xd   :  { %v81_v5 = vld [vmem:[#allocation5] sm:$0xff] }
  0x86   :  { %v58_v3 = vpop.f32.mrf.mxu0  ;;  %v78_v4 = vpop.f32.mrf.mxu1 }
  0x87   :  { %v79_v6 = vadd.f32 %v78_v4, %v58_v3 }
  0x89   :  { %v82_v7 = vadd.f32 %v81_v5, %v79_v6 }
  0x8b   :  { %84 = vst.msk [vmem:[#allocation5] sm:$0xff] %vm37_vm0, %v82_v7 }
  0x8c   :  { %95 = dma.vmem_to_hbm [thread:$0]  %s91_s11, 128, %s93_s14, [#allocation4]  }
  0x8d   :  { %157 = dma.done.wait [#allocation4], 128  }
  0x8e   :  { %158 = vsyncadd [#allocation4], 4294967168 }
  0x8f   :  { %100 = vsyncpa [#allocation3], 1 }
  0x90   :  { %101 = vsyncpa [#allocation4], 1 }

</bundles_post_ra>
